<compile_context>
chip_gen: v6e
topology: v6e:2x2x1
jax: 0.10.0
libtpu: 0.0.40
codegen_flags: <defaults>
</compile_context>

<pallas_src>
import functools

import jax
import jax.numpy as jnp
from jax import lax
from jax.experimental import pallas as pl
from jax.experimental.pallas import tpu as pltpu


def _round_up(x, m):
    return (x + m - 1) // m * m


def _spiking_block_kernel(x_ref, w_ref, b_ref, out_ref, v_ref, *,
                          TB, NB, HO, KH, WPCP, WOC, keep, v_threshold):
    """One grid step == one (batch tile, time block).

    x_ref  : [TB, NB, Hp, WPCP]   padded frame rows, K-padded to 128 (bf16)
    w_ref  : [KH, WPCP, WOC]      BN- and decay-folded Toeplitz weight (bf16)
    b_ref  : [1, WOC]             BN- and decay-folded bias (f32)
    out_ref: [TB, NB*HO, WOC]     spikes for this block (bf16, lane-dense)
    v_ref  : [NB*HO, WOC]         membrane potential, persists across tt (f32)

    Grid = (N//NB "parallel", T//TB "arbitrary").  INVARIANT: the time-block
    axis must remain the innermost, sequential ("arbitrary") axis — v_ref
    carries LIF state across consecutive tt steps and is re-initialised only
    at tt == 0 of each batch tile.  Reordering the grid corrupts v.
    """
    tt = pl.program_id(1)

    @pl.when(tt == 0)
    def _():
        v_ref[...] = jnp.zeros_like(v_ref)           # v_reset = 0

    M = TB * NB * HO

    # Conv (+ folded BN + folded decay) for ALL TB timesteps at once:
    # KH row-band matmuls, f32 accumulation on the MXU, bias as acc init.
    acc = jnp.broadcast_to(b_ref[...], (M, WOC)).astype(jnp.float32)
    for kh in range(KH):
        lhs = x_ref[:, :, kh:kh + HO, :].reshape(M, WPCP)   # [TB*NB*HO, WPCP]
        acc = acc + jnp.dot(lhs, w_ref[kh],
                            preferred_element_type=jnp.float32)
    acc = acc.reshape(TB, NB * HO, WOC)

    # Parametric LIF (decay_input=True, hard reset to 0); decay is already in
    # acc, so:  h_t = v*(1-decay) + acc_t.  TB is static -> trace-time unroll
    # (equivalent to lax.fori_loop(..., unroll=True)); all accesses lane-dense.
    v = v_ref[...]
    for t in range(TB):
        h = v * keep + acc[t]
        spike = h >= v_threshold
        out_ref[t] = spike.astype(out_ref.dtype)
        v = jnp.where(spike, 0.0, h)
    v_ref[...] = v


def _pick_tiles(N, T, HO, Hp, WPCP, WOC, KH, *, target_m=256,
                vmem_budget=40 * 1024 * 1024):
    """Choose (NB, TB): M = TB*NB*HO near the MXU-shaped target, keep >=2
    parallel batch tiles for v7x's two TensorCores when N >= 2, and keep the
    VMEM working set (double-buffered blocks + scratch + accumulator) within
    a v7x-safe ~40 MiB budget."""
    def working_set(tb, nb):
        x_blk = tb * nb * Hp * WPCP * 2          # bf16 input block
        o_blk = tb * nb * HO * WOC * 2           # bf16 output block
        w_blk = KH * WPCP * WOC * 2              # bf16 Toeplitz weight
        v_scr = nb * HO * WOC * 4                # f32 membrane scratch
        acc = tb * nb * HO * WOC * 4             # f32 conv accumulator value
        return 2 * x_blk + 2 * o_blk + 2 * w_blk + v_scr + acc

    div_n = [d for d in range(1, N + 1) if N % d == 0]
    cand = [d for d in div_n
            if (N // d >= 2 or N == 1)               # >=2 parallel tiles (v7x)
            and d * HO <= target_m
            and ((d * HO) % 8 == 0 or d == N)]       # 8-aligned output rows
    nb = max(cand) if cand else N

    div_t = [d for d in range(1, T + 1) if T % d == 0]
    ok = [d for d in div_t if working_set(d, nb) <= vmem_budget] or [1]
    big = [d for d in ok if d * nb * HO >= target_m]
    tb = min(big) if big else max(ok)
    return nb, tb, working_set(tb, nb)


def spiking_block_forward(x, conv_w, bn_gamma, bn_beta, *, padding=1,
                          v_threshold=1.0, init_tau=2.0, bn_eps=1e-5,
                          n_block=None, t_block=None, nchw_output=True):
    """x: [T, N, Cin, H, W] (PyTorch NCHW frames).

    Returns [T, N, Cout, Ho, Wo] float32 spikes (or the kernel-native
    lane-dense [T, N, Ho, Wo, Cout] bf16 layout if nchw_output=False, which
    avoids a full-tensor strided copy when chaining spiking layers).
    """
    T, N, Cin, H, W = x.shape
    Cout, Cin_w, KH, KW = conv_w.shape
    assert Cin_w == Cin, "groups > 1 not supported (TODO(synk))"

    Hp, Wp = H + 2 * padding, W + 2 * padding
    HO, WO = Hp - KH + 1, Wp - KW + 1            # stride = 1, conv padding = 0
    WPC, WOC = Wp * Cin, WO * Cout
    WPCP = _round_up(WPC, 128)                   # K padded to full lanes

    NB, TB, ws_bytes = _pick_tiles(N, T, HO, Hp, WPCP, WOC, KH)
    if n_block is not None:
        NB = n_block
    if t_block is not None:
        TB = t_block
    assert N % NB == 0 and T % TB == 0
    assert (NB * HO) % 8 == 0 or NB == N, "output tile rows must be 8-aligned"

    x = x.astype(jnp.float32)
    conv_w = conv_w.astype(jnp.float32)
    bn_gamma = bn_gamma.astype(jnp.float32)
    bn_beta = bn_beta.astype(jnp.float32)

    # --- BatchNorm2d training-mode statistics of the PADDED tensor, computed
    #     from the unpadded input via the area ratio (pad zeros contribute
    #     nothing to the sums).  Biased variance, as PyTorch normalises.
    ratio = float(H * W) / float(Hp * Wp)
    mean_u = jnp.mean(x, axis=(0, 1, 3, 4))
    e2_u = jnp.mean(x * x, axis=(0, 1, 3, 4))
    mean_p = mean_u * ratio
    var_p = e2_u * ratio - mean_p * mean_p
    inv_std = 1.0 / jnp.sqrt(var_p + bn_eps)
    scale = bn_gamma * inv_std                           # [Cin]
    shift = bn_beta - mean_p * scale                     # [Cin]

    # --- Fold BN into the conv weight (scale) and a per-Cout bias (shift),
    #     then fold the PLIF decay into both (h = v*(1-decay) + acc in-kernel).
    decay = 1.0 / init_tau                    # sigmoid(-log(init_tau - 1))
    w_s = conv_w * scale[None, :, None, None]            # [Cout, Cin, KH, KW]
    w_kcc = jnp.transpose(w_s, (2, 3, 1, 0))             # [KH, KW, Cin, Cout]
    # Toeplitz lowering: wt[kh, p*Cin+ci, wo*Cout+co] = W_s[kh, p-wo, ci, co]
    eye = jnp.stack([jnp.eye(Wp, WO, k=-kw, dtype=jnp.float32)
                     for kw in range(KW)])               # [KW, Wp, WO]
    wt = jnp.einsum('xpw,hxic->hpiwc', eye, w_kcc)       # [KH, Wp, Cin, WO, Cout]
    wt = wt.reshape(KH, WPC, WOC) * decay
    wt = jnp.pad(wt, ((0, 0), (0, WPCP - WPC), (0, 0))).astype(jnp.bfloat16)
    bias = jnp.einsum('oikl,i->o', conv_w, shift) * decay          # [Cout]
    bias_row = jnp.tile(bias, WO).reshape(1, WOC).astype(jnp.float32)

    # --- Input prep: NCHW -> padded, row-flattened NHWC (last dim Wp*Cin,
    #     zero-padded to a multiple of 128), cast to bf16.  One fused XLA copy.
    x_nhwc = jnp.transpose(x, (0, 1, 3, 4, 2))                       # [T,N,H,W,Cin]
    x_pad = jnp.pad(x_nhwc, ((0, 0), (0, 0),
                             (padding, padding), (padding, padding), (0, 0)))
    x_rows = x_pad.reshape(T, N, Hp, WPC)
    x_rows = jnp.pad(x_rows, ((0, 0), (0, 0), (0, 0), (0, WPCP - WPC)))
    x_rows = x_rows.astype(jnp.bfloat16)                             # [T,N,Hp,WPCP]

    kernel = functools.partial(
        _spiking_block_kernel,
        TB=TB, NB=NB, HO=HO, KH=KH, WPCP=WPCP, WOC=WOC,
        keep=1.0 - decay, v_threshold=v_threshold)

    out_bytes = T * N * HO * WOC * 2
    cost = pl.CostEstimate(
        flops=2 * T * N * HO * WOC * WPCP * KH + 6 * T * N * HO * WOC,
        transcendentals=0,
        bytes_accessed=int(x_rows.size * 2 + wt.size * 2
                           + bias_row.size * 4 + out_bytes))

    # Explicit scoped-VMEM limit: the derived working set (ws_bytes) is kept
    # <= ~40 MiB so the same tiling is v7x (64 MiB) safe; v5e/v6e could take
    # roughly 2x deeper time blocks if desired.
    vmem_limit = int(min(64 * 1024 * 1024, max(32 * 1024 * 1024, 2 * ws_bytes)))

    out_flat = pl.pallas_call(
        kernel,
        out_shape=jax.ShapeDtypeStruct((T, N * HO, WOC), jnp.bfloat16),
        grid_spec=pltpu.PrefetchScalarGridSpec(
            num_scalar_prefetch=0,
            grid=(N // NB, T // TB),                 # (batch tiles, time blocks)
            in_specs=[
                # one padded (batch-tile, time-block) of frame rows per step
                pl.BlockSpec((TB, NB, Hp, WPCP), lambda nb, tt: (tt, nb, 0, 0)),
                # BN/decay-folded Toeplitz weight / bias: constant blocks
                pl.BlockSpec((KH, WPCP, WOC), lambda nb, tt: (0, 0, 0)),
                pl.BlockSpec((1, WOC), lambda nb, tt: (0, 0)),
            ],
            out_specs=pl.BlockSpec((TB, NB * HO, WOC),
                                   lambda nb, tt: (tt, nb, 0)),
            # membrane potential: persists across the sequential time-block
            # axis, lane-dense layout matching the output
            scratch_shapes=[pltpu.VMEM((NB * HO, WOC), jnp.float32)],
        ),
        compiler_params=pltpu.CompilerParams(
            dimension_semantics=("parallel", "arbitrary"),
            vmem_limit_bytes=vmem_limit),
        cost_estimate=cost,
    )(x_rows, wt, bias_row)

    out = out_flat.reshape(T, N, HO, WO, Cout)
    if not nchw_output:
        return out                                     # lane-dense bf16 NHWC
    # Back to the PyTorch convention; full-tensor strided copy + f32 upcast —
    # skip it (nchw_output=False) when chaining spiking layers.
    return jnp.transpose(out, (0, 1, 4, 2, 3)).astype(jnp.float32)


def _reference_forward(x, conv_w, bn_gamma, bn_beta, *, padding,
                       v_threshold=1.0, init_tau=2.0, bn_eps=1e-5):
    """Pure-JAX f32 reference of the module forward (pad -> BN -> conv -> PLIF)."""
    T, N, Cin, H, W = x.shape
    Cout = conv_w.shape[0]
    p = padding
    xp = jnp.pad(x, ((0, 0), (0, 0), (0, 0), (p, p), (p, p)))
    mean = jnp.mean(xp, axis=(0, 1, 3, 4), keepdims=True)
    var = jnp.var(xp, axis=(0, 1, 3, 4), keepdims=True)
    g = bn_gamma.reshape(1, 1, Cin, 1, 1)
    b = bn_beta.reshape(1, 1, Cin, 1, 1)
    xn = (xp - mean) / jnp.sqrt(var + bn_eps) * g + b
    Hp, Wp = H + 2 * p, W + 2 * p
    y = lax.conv_general_dilated(
        xn.reshape(T * N, Cin, Hp, Wp), conv_w,
        window_strides=(1, 1), padding='VALID',
        dimension_numbers=('NCHW', 'OIHW', 'NCHW'),
        precision=lax.Precision.HIGHEST)
    HO, WO = Hp - conv_w.shape[2] + 1, Wp - conv_w.shape[3] + 1
    y = y.reshape(T, N, Cout, HO, WO)
    decay = 1.0 / init_tau
    v = jnp.zeros_like(y[0])
    spikes = []
    for t in range(T):
        h = v + (y[t] - v) * decay
        s = (h >= v_threshold).astype(jnp.float32)
        v = h * (1.0 - s)
        spikes.append(s)
    return jnp.stack(spikes)


if __name__ == "__main__":
    # Small deterministic example consistent with SpikingBlock(4, 8, 3, padding=1)
    T, N, Cin, H, W = 8, 2, 4, 16, 16
    Cout, K, pad = 8, 3, 1

    key = jax.random.PRNGKey(0)
    kx, kw, kg, kb = jax.random.split(key, 4)
    x = jax.random.normal(kx, (T, N, Cin, H, W), jnp.float32)
    conv_w = jax.random.normal(kw, (Cout, Cin, K, K), jnp.float32)
    conv_w = conv_w * (1.0 / (Cin * K * K) ** 0.5)          # kaiming-ish scale
    bn_gamma = 1.0 + 0.1 * jax.random.normal(kg, (Cin,), jnp.float32)
    bn_beta = 0.1 * jax.random.normal(kb, (Cin,), jnp.float32)

    out = spiking_block_forward(x, conv_w, bn_gamma, bn_beta, padding=pad)
    out = jax.block_until_ready(out)
    assert out.shape == (T, N, Cout, H, W), out.shape       # Ho=Wo=16 with pad=1
    assert bool(jnp.all((out == 0.0) | (out == 1.0))), "spikes must be binary"

    # Spikes are {0,1}; compare against the f32 reference.  The bf16 MXU path
    # can flip near-threshold spikes and flips compound through the membrane
    # recurrence over T, so allow a small mismatch fraction.
    ref = _reference_forward(x, conv_w, bn_gamma, bn_beta, padding=pad)
    flip_fraction = float(jnp.mean(jnp.abs(out - ref)))
    assert flip_fraction < 0.035, f"spike mismatch fraction {flip_fraction}"

    print("KERNEL_OK")
</pallas_src>

<mosaic_0001>
module attributes {stable_mosaic.version = 11 : i64} {
  func.func @_spiking_block_kernel(%arg0: i32, %arg1: i32, %arg2: memref<8x1x18x128xbf16, #tpu.memory_space<vmem>>, %arg3: memref<3x128x128xbf16, #tpu.memory_space<vmem>>, %arg4: memref<1x128xf32, #tpu.memory_space<vmem>>, %arg5: memref<8x16x128xbf16, #tpu.memory_space<vmem>>, %arg6: memref<16x128xf32, #tpu.memory_space<vmem>>) attributes {dimension_semantics = [#tpu.dimension_semantics<parallel>, #tpu.dimension_semantics<arbitrary>], iteration_bounds = array<i64: 2, 1>, scalar_prefetch = 0 : i64, scratch_operands = 1 : i64, tpu.core_type = #tpu.core_type<tc>, window_params = [{transform_indices = @transform_0, window_bounds = array<i64: 8, 1, 18, 128>}, {pipeline_mode = #tpu.pipeline_mode<synchronous>, transform_indices = @transform_1, window_bounds = array<i64: 3, 128, 128>}, {pipeline_mode = #tpu.pipeline_mode<synchronous>, transform_indices = @transform_2, window_bounds = array<i64: 1, 128>}, {transform_indices = @transform_3, window_bounds = array<i64: 8, 16, 128>}]} {
    %c0_i32 = arith.constant 0 : i32
    %0 = arith.cmpi eq, %arg1, %c0_i32 : i32
    %1 = arith.extui %0 : i1 to i32
    %c0_i32_0 = arith.constant 0 : i32
    %2 = arith.cmpi ne, %1, %c0_i32_0 : i32
    scf.if %2 {
      %cst_70 = arith.constant 0.000000e+00 : f32
      %147 = vector.broadcast %cst_70 : f32 to vector<16x128xf32>
      %c0_71 = arith.constant 0 : index
      %c0_72 = arith.constant 0 : index
      %148 = vector.load %arg6[%c0_71, %c0_72] : memref<16x128xf32, #tpu.memory_space<vmem>>, vector<16x128xf32>
      tpu.vector_store %arg6[%c0_71, %c0_72], %147 {strides = array<i32>} : memref<16x128xf32, #tpu.memory_space<vmem>>, vector<16x128xf32>,
    } else {
    }
    %c0 = arith.constant 0 : index
    %c0_1 = arith.constant 0 : index
    %3 = vector.load %arg4[%c0, %c0_1] : memref<1x128xf32, #tpu.memory_space<vmem>>, vector<1x128xf32>
    %4 = vector.shape_cast %3 : vector<1x128xf32> to vector<1x128xf32>
    %5 = vector.broadcast %4 : vector<1x128xf32> to vector<128x128xf32>
    %c0_2 = arith.constant 0 : index
    %c0_3 = arith.constant 0 : index
    %c0_4 = arith.constant 0 : index
    %c0_5 = arith.constant 0 : index
    %6 = vector.load %arg2[%c0_2, %c0_3, %c0_4, %c0_5] : memref<8x1x18x128xbf16, #tpu.memory_space<vmem>>, vector<8x1x16x128xbf16>
    %7 = vector.shape_cast %6 : vector<8x1x16x128xbf16> to vector<128x128xbf16>
    %c0_6 = arith.constant 0 : index
    %c0_7 = arith.constant 0 : index
    %c0_8 = arith.constant 0 : index
    %8 = vector.load %arg3[%c0_6, %c0_7, %c0_8] : memref<3x128x128xbf16, #tpu.memory_space<vmem>>, vector<1x128x128xbf16>
    %9 = vector.shape_cast %8 : vector<1x128x128xbf16> to vector<128x128xbf16>
    %cst = arith.constant dense<0.000000e+00> : vector<128x128xf32>
    %10 = tpu.matmul %7, %9, %cst {dimension_numbers = #tpu.dot_dimension_numbers<[1], [0], [0], [1], [0, 0, 1, 1], [], []>} : vector<128x128xbf16>, vector<128x128xbf16>, vector<128x128xf32> -> vector<128x128xf32>
    %11 = arith.addf %5, %10 : vector<128x128xf32>
    %c0_9 = arith.constant 0 : index
    %c0_10 = arith.constant 0 : index
    %c1 = arith.constant 1 : index
    %c0_11 = arith.constant 0 : index
    %12 = vector.load %arg2[%c0_9, %c0_10, %c1, %c0_11] : memref<8x1x18x128xbf16, #tpu.memory_space<vmem>>, vector<8x1x16x128xbf16>
    %13 = vector.shape_cast %12 : vector<8x1x16x128xbf16> to vector<128x128xbf16>
    %c1_12 = arith.constant 1 : index
    %c0_13 = arith.constant 0 : index
    %c0_14 = arith.constant 0 : index
    %14 = vector.load %arg3[%c1_12, %c0_13, %c0_14] : memref<3x128x128xbf16, #tpu.memory_space<vmem>>, vector<1x128x128xbf16>
    %15 = vector.shape_cast %14 : vector<1x128x128xbf16> to vector<128x128xbf16>
    %cst_15 = arith.constant dense<0.000000e+00> : vector<128x128xf32>
    %16 = tpu.matmul %13, %15, %cst_15 {dimension_numbers = #tpu.dot_dimension_numbers<[1], [0], [0], [1], [0, 0, 1, 1], [], []>} : vector<128x128xbf16>, vector<128x128xbf16>, vector<128x128xf32> -> vector<128x128xf32>
    %17 = arith.addf %11, %16 : vector<128x128xf32>
    %c0_16 = arith.constant 0 : index
    %c0_17 = arith.constant 0 : index
    %c2 = arith.constant 2 : index
    %c0_18 = arith.constant 0 : index
    %18 = vector.load %arg2[%c0_16, %c0_17, %c2, %c0_18] : memref<8x1x18x128xbf16, #tpu.memory_space<vmem>>, vector<8x1x16x128xbf16>
    %19 = vector.shape_cast %18 : vector<8x1x16x128xbf16> to vector<128x128xbf16>
    %c2_19 = arith.constant 2 : index
    %c0_20 = arith.constant 0 : index
    %c0_21 = arith.constant 0 : index
    %20 = vector.load %arg3[%c2_19, %c0_20, %c0_21] : memref<3x128x128xbf16, #tpu.memory_space<vmem>>, vector<1x128x128xbf16>
    %21 = vector.shape_cast %20 : vector<1x128x128xbf16> to vector<128x128xbf16>
    %cst_22 = arith.constant dense<0.000000e+00> : vector<128x128xf32>
    %22 = tpu.matmul %19, %21, %cst_22 {dimension_numbers = #tpu.dot_dimension_numbers<[1], [0], [0], [1], [0, 0, 1, 1], [], []>} : vector<128x128xbf16>, vector<128x128xbf16>, vector<128x128xf32> -> vector<128x128xf32>
    %23 = arith.addf %17, %22 : vector<128x128xf32>
    %24 = vector.shape_cast %23 : vector<128x128xf32> to vector<8x16x128xf32>
    %c0_23 = arith.constant 0 : index
    %c0_24 = arith.constant 0 : index
    %25 = vector.load %arg6[%c0_23, %c0_24] : memref<16x128xf32, #tpu.memory_space<vmem>>, vector<16x128xf32>
    %cst_25 = arith.constant 5.000000e-01 : f32
    %26 = vector.broadcast %cst_25 : f32 to vector<16x128xf32>
    %27 = arith.mulf %25, %26 : vector<16x128xf32>
    %28 = vector.extract_strided_slice %24 {offsets = [0, 0, 0], sizes = [1, 16, 128], strides = [1, 1, 1]} : vector<8x16x128xf32> to vector<1x16x128xf32>
    %29 = vector.shape_cast %28 : vector<1x16x128xf32> to vector<16x128xf32>
    %30 = arith.addf %27, %29 : vector<16x128xf32>
    %cst_26 = arith.constant 1.000000e+00 : f32
    %31 = vector.broadcast %cst_26 : f32 to vector<16x128xf32>
    %32 = arith.cmpf oge, %30, %31 : vector<16x128xf32>
    %33 = arith.extui %32 : vector<16x128xi1> to vector<16x128xi32>
    %34 = arith.sitofp %33 : vector<16x128xi32> to vector<16x128xf32>
    %35 = arith.truncf %34 : vector<16x128xf32> to vector<16x128xbf16>
    %c0_27 = arith.constant 0 : index
    %c0_28 = arith.constant 0 : index
    %c0_29 = arith.constant 0 : index
    %36 = vector.load %arg5[%c0_27, %c0_28, %c0_29] : memref<8x16x128xbf16, #tpu.memory_space<vmem>>, vector<1x16x128xbf16>
    %37 = vector.shape_cast %36 : vector<1x16x128xbf16> to vector<16x128xbf16>
    %38 = vector.shape_cast %35 : vector<16x128xbf16> to vector<1x16x128xbf16>
    tpu.vector_store %arg5[%c0_27, %c0_28, %c0_29], %38 {strides = array<i32>} : memref<8x16x128xbf16, #tpu.memory_space<vmem>>, vector<1x16x128xbf16>,
    %cst_30 = arith.constant 0.000000e+00 : f32
    %39 = vector.broadcast %cst_30 : f32 to vector<16x128xf32>
    %40 = arith.select %32, %39, %30 : vector<16x128xi1>, vector<16x128xf32>
    %cst_31 = arith.constant 5.000000e-01 : f32
    %41 = vector.broadcast %cst_31 : f32 to vector<16x128xf32>
    %42 = arith.mulf %40, %41 : vector<16x128xf32>
    %43 = vector.extract_strided_slice %24 {offsets = [1, 0, 0], sizes = [1, 16, 128], strides = [1, 1, 1]} : vector<8x16x128xf32> to vector<1x16x128xf32>
    %44 = vector.shape_cast %43 : vector<1x16x128xf32> to vector<16x128xf32>
    %45 = arith.addf %42, %44 : vector<16x128xf32>
    %cst_32 = arith.constant 1.000000e+00 : f32
    %46 = vector.broadcast %cst_32 : f32 to vector<16x128xf32>
    %47 = arith.cmpf oge, %45, %46 : vector<16x128xf32>
    %48 = arith.extui %47 : vector<16x128xi1> to vector<16x128xi32>
    %49 = arith.sitofp %48 : vector<16x128xi32> to vector<16x128xf32>
    %50 = arith.truncf %49 : vector<16x128xf32> to vector<16x128xbf16>
    %c1_33 = arith.constant 1 : index
    %c0_34 = arith.constant 0 : index
    %c0_35 = arith.constant 0 : index
    %51 = vector.load %arg5[%c1_33, %c0_34, %c0_35] : memref<8x16x128xbf16, #tpu.memory_space<vmem>>, vector<1x16x128xbf16>
    %52 = vector.shape_cast %51 : vector<1x16x128xbf16> to vector<16x128xbf16>
    %53 = vector.shape_cast %50 : vector<16x128xbf16> to vector<1x16x128xbf16>
    tpu.vector_store %arg5[%c1_33, %c0_34, %c0_35], %53 {strides = array<i32>} : memref<8x16x128xbf16, #tpu.memory_space<vmem>>, vector<1x16x128xbf16>,
    %cst_36 = arith.constant 0.000000e+00 : f32
    %54 = vector.broadcast %cst_36 : f32 to vector<16x128xf32>
    %55 = arith.select %47, %54, %45 : vector<16x128xi1>, vector<16x128xf32>
    %cst_37 = arith.constant 5.000000e-01 : f32
    %56 = vector.broadcast %cst_37 : f32 to vector<16x128xf32>
    %57 = arith.mulf %55, %56 : vector<16x128xf32>
    %58 = vector.extract_strided_slice %24 {offsets = [2, 0, 0], sizes = [1, 16, 128], strides = [1, 1, 1]} : vector<8x16x128xf32> to vector<1x16x128xf32>
    %59 = vector.shape_cast %58 : vector<1x16x128xf32> to vector<16x128xf32>
    %60 = arith.addf %57, %59 : vector<16x128xf32>
    %cst_38 = arith.constant 1.000000e+00 : f32
    %61 = vector.broadcast %cst_38 : f32 to vector<16x128xf32>
    %62 = arith.cmpf oge, %60, %61 : vector<16x128xf32>
    %63 = arith.extui %62 : vector<16x128xi1> to vector<16x128xi32>
    %64 = arith.sitofp %63 : vector<16x128xi32> to vector<16x128xf32>
    %65 = arith.truncf %64 : vector<16x128xf32> to vector<16x128xbf16>
    %c2_39 = arith.constant 2 : index
    %c0_40 = arith.constant 0 : index
    %c0_41 = arith.constant 0 : index
    %66 = vector.load %arg5[%c2_39, %c0_40, %c0_41] : memref<8x16x128xbf16, #tpu.memory_space<vmem>>, vector<1x16x128xbf16>
    %67 = vector.shape_cast %66 : vector<1x16x128xbf16> to vector<16x128xbf16>
    %68 = vector.shape_cast %65 : vector<16x128xbf16> to vector<1x16x128xbf16>
    tpu.vector_store %arg5[%c2_39, %c0_40, %c0_41], %68 {strides = array<i32>} : memref<8x16x128xbf16, #tpu.memory_space<vmem>>, vector<1x16x128xbf16>,
    %cst_42 = arith.constant 0.000000e+00 : f32
    %69 = vector.broadcast %cst_42 : f32 to vector<16x128xf32>
    %70 = arith.select %62, %69, %60 : vector<16x128xi1>, vector<16x128xf32>
    %cst_43 = arith.constant 5.000000e-01 : f32
    %71 = vector.broadcast %cst_43 : f32 to vector<16x128xf32>
    %72 = arith.mulf %70, %71 : vector<16x128xf32>
    %73 = vector.extract_strided_slice %24 {offsets = [3, 0, 0], sizes = [1, 16, 128], strides = [1, 1, 1]} : vector<8x16x128xf32> to vector<1x16x128xf32>
    %74 = vector.shape_cast %73 : vector<1x16x128xf32> to vector<16x128xf32>
    %75 = arith.addf %72, %74 : vector<16x128xf32>
    %cst_44 = arith.constant 1.000000e+00 : f32
    %76 = vector.broadcast %cst_44 : f32 to vector<16x128xf32>
    %77 = arith.cmpf oge, %75, %76 : vector<16x128xf32>
    %78 = arith.extui %77 : vector<16x128xi1> to vector<16x128xi32>
    %79 = arith.sitofp %78 : vector<16x128xi32> to vector<16x128xf32>
    %80 = arith.truncf %79 : vector<16x128xf32> to vector<16x128xbf16>
    %c3 = arith.constant 3 : index
    %c0_45 = arith.constant 0 : index
    %c0_46 = arith.constant 0 : index
    %81 = vector.load %arg5[%c3, %c0_45, %c0_46] : memref<8x16x128xbf16, #tpu.memory_space<vmem>>, vector<1x16x128xbf16>
    %82 = vector.shape_cast %81 : vector<1x16x128xbf16> to vector<16x128xbf16>
    %83 = vector.shape_cast %80 : vector<16x128xbf16> to vector<1x16x128xbf16>
    tpu.vector_store %arg5[%c3, %c0_45, %c0_46], %83 {strides = array<i32>} : memref<8x16x128xbf16, #tpu.memory_space<vmem>>, vector<1x16x128xbf16>,
    %cst_47 = arith.constant 0.000000e+00 : f32
    %84 = vector.broadcast %cst_47 : f32 to vector<16x128xf32>
    %85 = arith.select %77, %84, %75 : vector<16x128xi1>, vector<16x128xf32>
    %cst_48 = arith.constant 5.000000e-01 : f32
    %86 = vector.broadcast %cst_48 : f32 to vector<16x128xf32>
    %87 = arith.mulf %85, %86 : vector<16x128xf32>
    %88 = vector.extract_strided_slice %24 {offsets = [4, 0, 0], sizes = [1, 16, 128], strides = [1, 1, 1]} : vector<8x16x128xf32> to vector<1x16x128xf32>
    %89 = vector.shape_cast %88 : vector<1x16x128xf32> to vector<16x128xf32>
    %90 = arith.addf %87, %89 : vector<16x128xf32>
    %cst_49 = arith.constant 1.000000e+00 : f32
    %91 = vector.broadcast %cst_49 : f32 to vector<16x128xf32>
    %92 = arith.cmpf oge, %90, %91 : vector<16x128xf32>
    %93 = arith.extui %92 : vector<16x128xi1> to vector<16x128xi32>
    %94 = arith.sitofp %93 : vector<16x128xi32> to vector<16x128xf32>
    %95 = arith.truncf %94 : vector<16x128xf32> to vector<16x128xbf16>
    %c4 = arith.constant 4 : index
    %c0_50 = arith.constant 0 : index
    %c0_51 = arith.constant 0 : index
    %96 = vector.load %arg5[%c4, %c0_50, %c0_51] : memref<8x16x128xbf16, #tpu.memory_space<vmem>>, vector<1x16x128xbf16>
    %97 = vector.shape_cast %96 : vector<1x16x128xbf16> to vector<16x128xbf16>
    %98 = vector.shape_cast %95 : vector<16x128xbf16> to vector<1x16x128xbf16>
    tpu.vector_store %arg5[%c4, %c0_50, %c0_51], %98 {strides = array<i32>} : memref<8x16x128xbf16, #tpu.memory_space<vmem>>, vector<1x16x128xbf16>,
    %cst_52 = arith.constant 0.000000e+00 : f32
    %99 = vector.broadcast %cst_52 : f32 to vector<16x128xf32>
    %100 = arith.select %92, %99, %90 : vector<16x128xi1>, vector<16x128xf32>
    %cst_53 = arith.constant 5.000000e-01 : f32
    %101 = vector.broadcast %cst_53 : f32 to vector<16x128xf32>
    %102 = arith.mulf %100, %101 : vector<16x128xf32>
    %103 = vector.extract_strided_slice %24 {offsets = [5, 0, 0], sizes = [1, 16, 128], strides = [1, 1, 1]} : vector<8x16x128xf32> to vector<1x16x128xf32>
    %104 = vector.shape_cast %103 : vector<1x16x128xf32> to vector<16x128xf32>
    %105 = arith.addf %102, %104 : vector<16x128xf32>
    %cst_54 = arith.constant 1.000000e+00 : f32
    %106 = vector.broadcast %cst_54 : f32 to vector<16x128xf32>
    %107 = arith.cmpf oge, %105, %106 : vector<16x128xf32>
    %108 = arith.extui %107 : vector<16x128xi1> to vector<16x128xi32>
    %109 = arith.sitofp %108 : vector<16x128xi32> to vector<16x128xf32>
    %110 = arith.truncf %109 : vector<16x128xf32> to vector<16x128xbf16>
    %c5 = arith.constant 5 : index
    %c0_55 = arith.constant 0 : index
    %c0_56 = arith.constant 0 : index
    %111 = vector.load %arg5[%c5, %c0_55, %c0_56] : memref<8x16x128xbf16, #tpu.memory_space<vmem>>, vector<1x16x128xbf16>
    %112 = vector.shape_cast %111 : vector<1x16x128xbf16> to vector<16x128xbf16>
    %113 = vector.shape_cast %110 : vector<16x128xbf16> to vector<1x16x128xbf16>
    tpu.vector_store %arg5[%c5, %c0_55, %c0_56], %113 {strides = array<i32>} : memref<8x16x128xbf16, #tpu.memory_space<vmem>>, vector<1x16x128xbf16>,
    %cst_57 = arith.constant 0.000000e+00 : f32
    %114 = vector.broadcast %cst_57 : f32 to vector<16x128xf32>
    %115 = arith.select %107, %114, %105 : vector<16x128xi1>, vector<16x128xf32>
    %cst_58 = arith.constant 5.000000e-01 : f32
    %116 = vector.broadcast %cst_58 : f32 to vector<16x128xf32>
    %117 = arith.mulf %115, %116 : vector<16x128xf32>
    %118 = vector.extract_strided_slice %24 {offsets = [6, 0, 0], sizes = [1, 16, 128], strides = [1, 1, 1]} : vector<8x16x128xf32> to vector<1x16x128xf32>
    %119 = vector.shape_cast %118 : vector<1x16x128xf32> to vector<16x128xf32>
    %120 = arith.addf %117, %119 : vector<16x128xf32>
    %cst_59 = arith.constant 1.000000e+00 : f32
    %121 = vector.broadcast %cst_59 : f32 to vector<16x128xf32>
    %122 = arith.cmpf oge, %120, %121 : vector<16x128xf32>
    %123 = arith.extui %122 : vector<16x128xi1> to vector<16x128xi32>
    %124 = arith.sitofp %123 : vector<16x128xi32> to vector<16x128xf32>
    %125 = arith.truncf %124 : vector<16x128xf32> to vector<16x128xbf16>
    %c6 = arith.constant 6 : index
    %c0_60 = arith.constant 0 : index
    %c0_61 = arith.constant 0 : index
    %126 = vector.load %arg5[%c6, %c0_60, %c0_61] : memref<8x16x128xbf16, #tpu.memory_space<vmem>>, vector<1x16x128xbf16>
    %127 = vector.shape_cast %126 : vector<1x16x128xbf16> to vector<16x128xbf16>
    %128 = vector.shape_cast %125 : vector<16x128xbf16> to vector<1x16x128xbf16>
    tpu.vector_store %arg5[%c6, %c0_60, %c0_61], %128 {strides = array<i32>} : memref<8x16x128xbf16, #tpu.memory_space<vmem>>, vector<1x16x128xbf16>,
    %cst_62 = arith.constant 0.000000e+00 : f32
    %129 = vector.broadcast %cst_62 : f32 to vector<16x128xf32>
    %130 = arith.select %122, %129, %120 : vector<16x128xi1>, vector<16x128xf32>
    %cst_63 = arith.constant 5.000000e-01 : f32
    %131 = vector.broadcast %cst_63 : f32 to vector<16x128xf32>
    %132 = arith.mulf %130, %131 : vector<16x128xf32>
    %133 = vector.extract_strided_slice %24 {offsets = [7, 0, 0], sizes = [1, 16, 128], strides = [1, 1, 1]} : vector<8x16x128xf32> to vector<1x16x128xf32>
    %134 = vector.shape_cast %133 : vector<1x16x128xf32> to vector<16x128xf32>
    %135 = arith.addf %132, %134 : vector<16x128xf32>
    %cst_64 = arith.constant 1.000000e+00 : f32
    %136 = vector.broadcast %cst_64 : f32 to vector<16x128xf32>
    %137 = arith.cmpf oge, %135, %136 : vector<16x128xf32>
    %138 = arith.extui %137 : vector<16x128xi1> to vector<16x128xi32>
    %139 = arith.sitofp %138 : vector<16x128xi32> to vector<16x128xf32>
    %140 = arith.truncf %139 : vector<16x128xf32> to vector<16x128xbf16>
    %c7 = arith.constant 7 : index
    %c0_65 = arith.constant 0 : index
    %c0_66 = arith.constant 0 : index
    %141 = vector.load %arg5[%c7, %c0_65, %c0_66] : memref<8x16x128xbf16, #tpu.memory_space<vmem>>, vector<1x16x128xbf16>
    %142 = vector.shape_cast %141 : vector<1x16x128xbf16> to vector<16x128xbf16>
    %143 = vector.shape_cast %140 : vector<16x128xbf16> to vector<1x16x128xbf16>
    tpu.vector_store %arg5[%c7, %c0_65, %c0_66], %143 {strides = array<i32>} : memref<8x16x128xbf16, #tpu.memory_space<vmem>>, vector<1x16x128xbf16>,
    %cst_67 = arith.constant 0.000000e+00 : f32
    %144 = vector.broadcast %cst_67 : f32 to vector<16x128xf32>
    %145 = arith.select %137, %144, %135 : vector<16x128xi1>, vector<16x128xf32>
    %c0_68 = arith.constant 0 : index
    %c0_69 = arith.constant 0 : index
    %146 = vector.load %arg6[%c0_68, %c0_69] : memref<16x128xf32, #tpu.memory_space<vmem>>, vector<16x128xf32>
    tpu.vector_store %arg6[%c0_68, %c0_69], %145 {strides = array<i32>} : memref<16x128xf32, #tpu.memory_space<vmem>>, vector<16x128xf32>,
    return
  }
  func.func @transform_0(%arg0: i32, %arg1: i32) -> (i32, i32, i32, i32) {
    %c0_i32 = arith.constant 0 : i32
    %c0_i32_0 = arith.constant 0 : i32
    %c0_i32_1 = arith.constant 0 : i32
    return %arg1, %arg0, %c0_i32, %c0_i32_0 : i32, i32, i32, i32
  }
  func.func @transform_1(%arg0: i32, %arg1: i32) -> (i32, i32, i32) {
    %c0_i32 = arith.constant 0 : i32
    %c0_i32_0 = arith.constant 0 : i32
    %c0_i32_1 = arith.constant 0 : i32
    %c0_i32_2 = arith.constant 0 : i32
    return %c0_i32, %c0_i32_0, %c0_i32_1 : i32, i32, i32
  }
  func.func @transform_2(%arg0: i32, %arg1: i32) -> (i32, i32) {
    %c0_i32 = arith.constant 0 : i32
    %c0_i32_0 = arith.constant 0 : i32
    %c0_i32_1 = arith.constant 0 : i32
    return %c0_i32, %c0_i32_0 : i32, i32
  }
  func.func @transform_3(%arg0: i32, %arg1: i32) -> (i32, i32, i32) {
    %c0_i32 = arith.constant 0 : i32
    %c0_i32_0 = arith.constant 0 : i32
    return %arg1, %arg0, %c0_i32 : i32, i32, i32
  }
}

</mosaic_0001>

<bundles_post_ra>
// kernel: tpu_custom_call.1
= control target key start
LH: loop header
LB: loop body
LE: loop exit
PB: predicated region body
PF: predicated region fallthrough
CT: control target
= control target key end

     0   :  { %8 = vsyncpa [#allocation5], 0  ;;  %s2715_s0 = inlined_call_operand.vmem [shape: bf16[8,2,18,128], index: 0, kind: input, shape index: {}]   ;;  %s2716_s1 = inlined_call_operand.vmem [shape: bf16[3,128,128], index: 1, kind: input, shape index: {}]   ;;  %s2717_s2 = inlined_call_operand.vmem [shape: f32[1,128], index: 2, kind: input, shape index: {}]   ;;  %s2718_s3 = inlined_call_operand.hbm [shape: bf16[8,32,128], index: 3, kind: output, shape index: {}]  }
   0x1   :  { %10 = vsyncpa [#allocation5 + $0x1], 0  ;;  %s2160_s12 = smov 0   ;;  %s2162_s13 = smov 0  }
   0x2   :  { %s2164_s14 = smov 0   ;;  %s2166_s15 = smov 0  }
   0x3   :  { %s2168_s16 = smov 0   ;;  %s2170_s17 = smov 0  }
   0x4 LB: > { %s1621_s18 = sadd.s32 4294967295, %s2130_s17   ;;  %s1622_s19 = sadd.s32 4294967294, %s2130_s17   ;;  %s2130_s17 = sphi %s2170_s17, %s16_s17   ;;  %s2126_s16 = sphi %s2168_s16, %s2729_s16   ;;  %s2122_s15 = sphi %s2166_s15, %s2728_s15   ;;  %s2118_s14 = sphi %s2164_s14, %s2727_s14   ;;  %s2114_s13 = sphi %s2162_s13, %s2726_s13   ;;  %s2110_s12 = sphi %s2160_s12, %s2725_s12  }
   0x5   : > { %s28_s20 = sadd.s32 1, %s2126_s16  ;;  %s37_s21 = sadd.s32 1, %s2118_s14 }
   0x6   : > { %p30_p0 = scmp.ge.s32.totalorder %s28_s20, 2  ;;  %p44_p1 = scmp.ne.s32.totalorder %s2118_s14, %s2114_s13 }
   0x7   : > { %p45_p2 = scmp.eq.s32.totalorder %s2130_s17, 0  ;;  %p118_p3 = scmp.eq.s32.totalorder %s1621_s18, 1 }
   0x8   : > { %s2731_s20 = smov (%p30_p0, %s28_s20), 0  ;;  %p123_p6 = scmp.ne.s32.totalorder %s2114_s13, %s2110_s12 }
   0x9   : > { %p46_p4 = por %p45_p2, %p44_p1  ;;  %p2199_p5 = por %p118_p3, %p44_p1 }
   0xa   : > { %s33_s23 = ssub.s32 %s2126_s16, %s2731_s20  ;;  %p124_p8 = scmp.eq.s32.totalorder %s1622_s19, 1 }
   0xb   : > { %p35_p7 = scmp.eq.s32.totalorder %s33_s23, 0  ;;  %p1624_p10 = scmp.ge.s32.totalorder %s2130_s17, 2 }
   0xc   : > { %p2210_p9 = por %p124_p8, %p123_p6 }
   0xd   : > { %s2208_s24 = scalar_select %p35_p7, %s2118_s14, %s37_s21  }
   0xe   : > { %146 = sbr.rel (%p1624_p10) target bundleno = 32 (0x20), region = 24 }
  0x13   : > { %149 = sbr.rel (!%p46_p4) target bundleno = 32 (0x20), region = 28  ;;  %s151_s26 = sand.u32 (%p46_p4), 1, %s2118_s14  }
  0x14   : > { %s1977_s27 = smul.u32 (%p46_p4), 12, %s2126_s16 }
  0x15   : > { %s1976_s28 = smul.u32 (%p46_p4), 96, %s151_s26 }
  0x16   : > { %s2222_s4 = scalar_lea.vmem (%p46_p4), %s2715_s0, %s1977_s27 }
  0x17   : > { %v176_v0 = vld [vmem:[%s2222_s4] sm:$0xff] (%p46_p4)   ;;  %v180_v1 = vld [vmem:[%s2222_s4 + $0x8] sm:$0xf] (%p46_p4)  ;;  %v182_v2 = vld [vmem:[%s2222_s4 + $0x18] sm:$0xff] (%p46_p4)   ;;  %s153_s5 = scalar_lea.vmem (%p46_p4), [#allocation3], %s1976_s28 }
  0x18   : > { %177 = vst [vmem:[%s153_s5] sm:$0xff] %v176_v0   ;;  %181 = vst [vmem:[%s153_s5 + $0x8] sm:$0xf] %v180_v1  ;;  %v186_v3 = vld [vmem:[%s2222_s4 + $0x20] sm:$0xf]  ;;  %v188_v4 = vld [vmem:[%s2222_s4 + $0x30] sm:$0xff]  }
  0x19   : > { %183 = vst [vmem:[%s153_s5 + $0xc] sm:$0xff] %v182_v2   ;;  %v192_v5 = vld [vmem:[%s2222_s4 + $0x38] sm:$0xf]  ;;  %187 = vst [vmem:[%s153_s5 + $0x14] sm:$0xf] %v186_v3  ;;  %v194_v6 = vld [vmem:[%s2222_s4 + $0x48] sm:$0xff]  }
  0x1a   : > { %189 = vst [vmem:[%s153_s5 + $0x18] sm:$0xff] %v188_v4   ;;  %193 = vst [vmem:[%s153_s5 + $0x20] sm:$0xf] %v192_v5  ;;  %v198_v7 = vld [vmem:[%s2222_s4 + $0x50] sm:$0xf]  ;;  %v200_v8 = vld [vmem:[%s2222_s4 + $0x60] sm:$0xff]  }
  0x1b   : > { %195 = vst [vmem:[%s153_s5 + $0x24] sm:$0xff] %v194_v6   ;;  %199 = vst [vmem:[%s153_s5 + $0x2c] sm:$0xf] %v198_v7  ;;  %v204_v9 = vld [vmem:[%s2222_s4 + $0x68] sm:$0xf]  ;;  %v206_v10 = vld [vmem:[%s2222_s4 + $0x78] sm:$0xff]  }
  0x1c   : > { %201 = vst [vmem:[%s153_s5 + $0x30] sm:$0xff] %v200_v8   ;;  %v210_v11 = vld [vmem:[%s2222_s4 + $0x80] sm:$0xf]  ;;  %205 = vst [vmem:[%s153_s5 + $0x38] sm:$0xf] %v204_v9  ;;  %v212_v12 = vld [vmem:[%s2222_s4 + $0x90] sm:$0xff]  }
  0x1d   : > { %207 = vst [vmem:[%s153_s5 + $0x3c] sm:$0xff] %v206_v10   ;;  %211 = vst [vmem:[%s153_s5 + $0x44] sm:$0xf] %v210_v11  ;;  %v216_v13 = vld [vmem:[%s2222_s4 + $0x98] sm:$0xf]  ;;  %v218_v14 = vld [vmem:[%s2222_s4 + $0xa8] sm:$0xff]  }
  0x1e   : > { %213 = vst [vmem:[%s153_s5 + $0x48] sm:$0xff] %v212_v12   ;;  %217 = vst [vmem:[%s153_s5 + $0x50] sm:$0xf] %v216_v13  ;;  %v222_v15 = vld [vmem:[%s2222_s4 + $0xb0] sm:$0xf] }
  0x1f   : > { %219 = vst [vmem:[%s153_s5 + $0x54] sm:$0xff] %v218_v14   ;;  %223 = vst [vmem:[%s153_s5 + $0x5c] sm:$0xf] %v222_v15 }
  0x20 PF: > { %p1626_p11 = scmp.ge.s32.totalorder %s2130_s17, 1  ;;  %p294_p12 = scmp.lt.s32.totalorder %s2130_s17, 3 }
  0x22   : > { %p295_p13 = pnand %p1626_p11, %p294_p12 }
  0x23   : > { %s2249_s10 = sand.u32 (!%p295_p13), 1, %s2114_s13  }
  0x24   : > { %298 = sbr.rel (%p295_p13) target bundleno = 363 (0x16b), region = 69  ;;  %s1627_s11 = sshll.u32 (!%p295_p13), %s2249_s10, 6 }
  0x25   : > { %s1978_s6 = smul.u32 (!%p295_p13), 96, %s2249_s10  ;;  %s2615_s18 = scalar_lea.vmem (!%p295_p13), [#allocation4], %s1627_s11 }
  0x26   : > { %s1500_s19 = scalar_lea.sflag (!%p295_p13), [#allocation5], %s2249_s10 }
  0x27   : > { %s2282_s26 = scalar_lea.vmem (!%p295_p13), [#allocation3], %s1978_s6 }
  0x29   : > { %v2048_v16 = vld [vmem:[%s2716_s1 + $0x38] sm:$0xff]   ;;  %v2050_v18 = vld [vmem:[%s2716_s1 + $0x30] sm:$0xff]   ;;  %v2052_v20 = vld [vmem:[%s2716_s1 + $0x28] sm:$0xff]   ;;  %vm606_vm0 = vsmask.f32 3328  ;;  %vm1043_vm3 = vcmask 1042432  }
  0x2a   : > { %v2049_v17 = vld [vmem:[%s2716_s1 + $0x78] sm:$0xff]   ;;  %1864 = vmatprep.subr.bf16.mxu0 %v2048_v16  ;;  %v2051_v19 = vld [vmem:[%s2716_s1 + $0x70] sm:$0xff]   ;;  %v2053_v21 = vld [vmem:[%s2716_s1 + $0x68] sm:$0xff]   ;;  %vm607_vm1 = vsmask.f32 7440  ;;  %vm1044_vm4 = vcmask 1046532  }
  0x2b   : > { %1896 = vmatprep.subr.bf16.mxu1 %v2049_v17  ;;  %1865 = vmatpush3.bf16.msra.mxu0 %v2048_v16  ;;  %v2054_v22 = vld [vmem:[%s2716_s1 + $0x20] sm:$0xff]   ;;  %v2056_v24 = vld [vmem:[%s2716_s1 + $0x18] sm:$0xff]   ;;  %v2058_v26 = vld [vmem:[%s2716_s1 + $0x10] sm:$0xff]  }
  0x2c   : > { %1897 = vmatpush3.bf16.msra.mxu1 %v2049_v17  ;;  %1866 = vmatprep.subr.bf16.mxu0 %v2050_v18  ;;  %v2055_v23 = vld [vmem:[%s2716_s1 + $0x60] sm:$0xff]   ;;  %v2057_v25 = vld [vmem:[%s2716_s1 + $0x58] sm:$0xff]   ;;  %v2059_v27 = vld [vmem:[%s2716_s1 + $0x50] sm:$0xff]  }
  0x2d   : > { %1898 = vmatprep.subr.bf16.mxu1 %v2051_v19  ;;  %v2064_v28 = vld [vmem:[%s2282_s26] sm:$0xff]   ;;  %v2290_v31 = vld [vmem:[%s2282_s26 + $0x8] sm:$0x1]  ;;  %v585_v44 = vld [vmem:[%s2282_s26 + $0xc] sm:$0xf] }
  0x2e   : > { %v582_v29 = vld [vmem:[%s2282_s26] sm:$0xf]  ;;  %v2287_v30 = vld [vmem:[%s2282_s26 + $0x4] sm:$0xf]  ;;  %1880 = vmatprep.mubr.bf16.mxu0 %v2064_v28  ;;  %v2060_v34 = vld [vmem:[%s2716_s1 + $0x8] sm:$0xff]   ;;  %v629_v37 = vshll.u32 %v2290_v31, 16 }
  0x2f   : > { %1867 = vmatpush3.bf16.msra.mxu0 %v2050_v18  ;;  %v610_v32 = vshrl.u32 %v582_v29, 16  ;;  %v613_v33 = vshll.u32 %v582_v29, 16  ;;  %v619_v35 = vshll.u32 %v2287_v30, 16  ;;  %v623_v36 = vshrl.u32 %v2287_v30, 16  ;;  %v2061_v40 = vld [vmem:[%s2716_s1 + $0x48] sm:$0xff]   ;;  %v2062_v45 = vld [vmem:[%s2716_s1] sm:$0xff]   ;;  %vm2316_vm2 = vmor %vm606_vm0, %vm607_vm1 }
  0x30   : > { %1899 = vmatpush3.bf16.msra.mxu1 %v2051_v19  ;;  %1868 = vmatprep.subr.bf16.mxu0 %v2052_v20  ;;  %v631_v43 = vrot.slane %v629_v37, 5  ;;  %v2306_v47 = vld [vmem:[%s2282_s26 + $0x10] sm:$0xf]  ;;  %v2309_v48 = vld [vmem:[%s2282_s26 + $0x14] sm:$0x1]  ;;  %v634_v49 = vshrl.u32 %v585_v44, 16  ;;  %vm2406_vm5 = vmor %vm1043_vm3, %vm1044_vm4 }
  0x31   : > { %1900 = vmatprep.subr.bf16.mxu1 %v2053_v21  ;;  %v612_v38 = vrot.slane %v610_v32, 4  ;;  %v615_v39 = vrot.slane %v613_v33, 5  ;;  %v621_v41 = vrot.slane %v619_v35, 5  ;;  %v625_v42 = vrot.slane %v623_v36, 4  ;;  %v2063_v51 = vld [vmem:[%s2716_s1 + $0x40] sm:$0xff]   ;;  %v2065_v10 = vld [vmem:[%s2282_s26 + $0xc] sm:$0xff]  }
  0x32   : > { %v637_v50 = vshll.u32 %v585_v44, 16  ;;  %v643_v54 = vshll.u32 %v2306_v47, 16  ;;  %v647_v55 = vshrl.u32 %v2306_v47, 16  ;;  %v653_v56 = vshll.u32 %v2309_v48, 16  ;;  %v588_v7 = vld [vmem:[%s2282_s26 + $0x18] sm:$0xf] }
  0x33   : > { %1869 = vmatpush3.bf16.msra.mxu0 %v2052_v20  ;;  %v616_v46 = vor.u32 %v615_v39, %v612_v38  ;;  %v626_v53 = vor.u32 %v625_v42, %v621_v41  ;;  %v636_v58 = vrot.slane %v634_v49, 4  ;;  %v1055_v60 = vrot.slane %v2306_v47, 5  ;;  %v2335_v8 = vld [vmem:[%s2282_s26 + $0x1c] sm:$0xf]  ;;  %v2342_v13 = vld [vmem:[%s2282_s26 + $0x20] sm:$0x1] }
  0x34   : > { %1901 = vmatpush3.bf16.msra.mxu1 %v2053_v21  ;;  %1870 = vmatprep.subr.bf16.mxu0 %v2054_v22  ;;  %v639_v59 = vrot.slane %v637_v50, 5  ;;  %v1051_v62 = vrot.slane %v2290_v31, 5  ;;  %v645_v63 = vrot.slane %v643_v54, 5  ;;  %v649_v0 = vrot.slane %v647_v55, 4  ;;  %v2066_v12 = vld [vmem:[%s2716_s1 + $0xb8] sm:$0xff]   ;;  %v2069_v55 = vld [vmem:[%s2282_s26 + $0x24] sm:$0xff]  }
  0x35   : > { %1902 = vmatprep.subr.bf16.mxu1 %v2055_v23  ;;  %v617_v57 = vrot.slane %v616_v46, 4  ;;  %v627_v61 = vrot.slane %v626_v53, 4  ;;  %v655_v3 = vrot.slane %v653_v56, 5  ;;  %v2329_v4 = vrot.slane %v1055_v60, 4  ;;  %v2356_v29 = vld [vmem:[%s2282_s26 + $0x28] sm:$0xf] }
  0x36   : > { %v640_v2 = vor.u32 %v639_v59, %v636_v58  ;;  %v650_v6 = vor.u32 %v649_v0, %v645_v63  ;;  %v658_v14 = vshrl.u32 %v588_v7, 16  ;;  %v661_v15 = vshll.u32 %v588_v7, 16  ;;  %v2068_v37 = vld [vmem:[%s2282_s26 + $0x18] sm:$0xff]   ;;  %v2070_v53 = vld [vmem:[%s2716_s1 + $0xa8] sm:$0xff]  }
  0x37   : > { %1871 = vmatpush3.bf16.msra.mxu0 %v2054_v22  ;;  %v622_v1 = vsel %vm2316_vm2, %v617_v57, %v621_v41  ;;  %v632_v5 = vsel %vm2316_vm2, %v627_v61, %v631_v43  ;;  %v667_v17 = vshll.u32 %v2335_v8, 16  ;;  %v671_v18 = vshrl.u32 %v2335_v8, 16  ;;  %v594_v57 = vld [vmem:[%s2282_s26 + $0x30] sm:$0xf]  ;;  %v2376_v61 = vld [vmem:[%s2282_s26 + $0x34] sm:$0xf] }
  0x38   : > { %1903 = vmatpush3.bf16.msra.mxu1 %v2055_v23  ;;  %1872 = vmatprep.subr.bf16.mxu0 %v2056_v24  ;;  %v1661_v9 = vcombine.low %v622_v1, %v632_v5  ;;  %v641_v11 = vrot.slane %v640_v2, 4  ;;  %v651_v16 = vrot.slane %v650_v6, 4  ;;  %v677_v19 = vshll.u32 %v2342_v13, 16  ;;  %v591_v23 = vld [vmem:[%s2282_s26 + $0x24] sm:$0xf]  ;;  %v2072_v6 = vld [vmem:[%s2282_s26 + $0x30] sm:$0xff]  }
  0x39   : > { %1904 = vmatprep.subr.bf16.mxu1 %v2057_v25  ;;  %v660_v21 = vrot.slane %v658_v14, 4  ;;  %v663_v22 = vrot.slane %v661_v15, 5  ;;  %v682_v35 = vshrl.u32 %v591_v23, 16  ;;  %v685_v36 = vshll.u32 %v591_v23, 16  ;;  %v2384_v5 = vld [vmem:[%s2716_s1 + $0xa0] sm:$0xff]  }
  0x3a   : > { %1912 = vmatprep.mubr.bf16.mxu1 %v1661_v9  ;;  %v646_v20 = vsel %vm2316_vm2, %v641_v11, %v645_v63  ;;  %v679_v28 = vrot.slane %v677_v19, 5  ;;  %v691_v39 = vshll.u32 %v2356_v29, 16  ;;  %v1058_v42 = vrot.slane %v2309_v48, 5  ;;  %v2379_v63 = vld [vmem:[%s2282_s26 + $0x38] sm:$0x1] }
  0x3b   : > { %1873 = vmatpush3.bf16.msra.mxu0 %v2056_v24  ;;  %v656_v24 = vsel %vm2316_vm2, %v651_v16, %v655_v3  ;;  %v664_v33 = vor.u32 %v663_v22, %v660_v21  ;;  %v684_v44 = vrot.slane %v682_v35, 4  ;;  %v706_v0 = vshrl.u32 %v594_v57, 16  ;;  %v2394_v19 = vld [vmem:[%s2282_s26 + $0x40] sm:$0xf]  ;;  %v2399_v23 = vld [vmem:[%s2282_s26 + $0x44] sm:$0x1] }
  0x3c   : > { %1905 = vmatpush3.bf16.msra.mxu1 %v2057_v25  ;;  %1874 = vmatprep.subr.bf16.mxu0 %v2058_v26  ;;  %v2067_v25 = vld [vmem:[%s2716_s1 + $0xb0] sm:$0xff]   ;;  %v1662_v32 = vcombine.low %v646_v20, %v656_v24  ;;  %v693_v49 = vrot.slane %v691_v39, 5  ;;  %v709_v1 = vshll.u32 %v594_v57, 16  ;;  %v715_v7 = vshll.u32 %v2376_v61, 16 }
  0x3d   : > { %1906 = vmatprep.subr.bf16.mxu1 %v2059_v27  ;;  %v665_v43 = vrot.slane %v664_v33, 4  ;;  %v719_v9 = vshrl.u32 %v2376_v61, 16  ;;  %v708_v11 = vrot.slane %v706_v0, 4  ;;  %v725_v14 = vshll.u32 %v2379_v63, 16  ;;  %v2438_v0 = vld [vmem:[%s2282_s26 + $0x4c] sm:$0xf] }
  0x3e   : > { %v717_v16 = vrot.slane %v715_v7, 5  ;;  %v743_v35 = vshrl.u32 %v2394_v19, 16  ;;  %v2434_v57 = vsel %vm2406_vm5, %v2329_v4, %v1058_v42  ;;  %v763_v48 = vshll.u32 %v2438_v0, 16 }
  0x3f   : > { %1875 = vmatpush3.bf16.msra.mxu0 %v2058_v26  ;;  %v669_v26 = vrot.slane %v667_v17, 5  ;;  %v721_v17 = vrot.slane %v719_v9, 4  ;;  %v727_v22 = vrot.slane %v725_v14, 5  ;;  %v767_v7 = vshrl.u32 %v2438_v0, 16 }
  0x40   : > { %1907 = vmatpush3.bf16.msra.mxu1 %v2059_v27  ;;  %1876 = vmatprep.subr.bf16.mxu0 %v2060_v34  ;;  %v673_v27 = vrot.slane %v671_v18, 4  ;;  %v597_v18 = vld [vmem:[%s2282_s26 + $0x3c] sm:$0xf]  ;;  %v765_v14 = vrot.slane %v763_v48, 5  ;;  %v1062_v52 = vrot.slane %v2335_v8, 5 }
  0x41   : > { %1908 = vmatprep.subr.bf16.mxu1 %v2061_v40  ;;  %v670_v54 = vsel %vm2316_vm2, %v665_v43, %v669_v26  ;;  %v730_v24 = vshrl.u32 %v597_v18, 16  ;;  %v1016_v48 = vld [vmem:[%s2282_s26 + $0x3c] sm:$0xe] }
  0x42   : > { %v674_v38 = vor.u32 %v673_v27, %v669_v26  ;;  %v722_v26 = vor.u32 %v721_v17, %v717_v16  ;;  %v733_v27 = vshll.u32 %v597_v18, 16  ;;  %v2457_v17 = vld [vmem:[%s2716_s1 + $0x88] sm:$0xff]  }
  0x43   : > { %1877 = vmatpush3.bf16.msra.mxu0 %v2060_v34  ;;  %v2359_v34 = vld [vmem:[%s2282_s26 + $0x2c] sm:$0x1]  ;;  %v732_v33 = vrot.slane %v730_v24, 4 }
  0x44   : > { %1909 = vmatpush3.bf16.msra.mxu1 %v2061_v40  ;;  %1878 = vmatprep.subr.bf16.mxu0 %v2062_v45  ;;  %v695_v40 = vshrl.u32 %v2356_v29, 16  ;;  %v701_v41 = vshll.u32 %v2359_v34, 16  ;;  %v675_v46 = vrot.slane %v674_v38, 4  ;;  %v723_v38 = vrot.slane %v722_v26, 4 }
  0x45   : > { %1910 = vmatprep.subr.bf16.mxu1 %v2063_v51  ;;  %v735_v39 = vrot.slane %v733_v27, 5 }
  0x46   : > { %v697_v50 = vrot.slane %v695_v40, 4  ;;  %v680_v58 = vsel %vm2316_vm2, %v675_v46, %v679_v28  ;;  %v739_v28 = vshll.u32 %v2394_v19, 16 }
  0x47   : > { %1879 = vmatpush3.bf16.msra.mxu0 %v2062_v45  ;;  %v687_v45 = vrot.slane %v685_v36, 5  ;;  %v1663_v2 = vcombine.low %v670_v54, %v680_v58  ;;  %v749_v36 = vshll.u32 %v2399_v23, 16  ;;  %v1086_v54 = vrot.slane %v2399_v23, 5 }
  0x48   : > { %1911 = vmatpush3.bf16.msra.mxu1 %v2063_v51  ;;  %1928 = vmatprep.subr.bf16.mxu0 %v2066_v12  ;;  %v703_v51 = vrot.slane %v701_v41, 5  ;;  %v698_v59 = vor.u32 %v697_v50, %v693_v49  ;;  %v741_v40 = vrot.slane %v739_v28, 5  ;;  %v2074_v41 = vld [vmem:[%s2716_s1 + $0x98] sm:$0xff]   ;;  %v728_v50 = vsel %vm2316_vm2, %v723_v38, %v727_v22 }
  0x49   : > { %1960 = vmatprep.subr.bf16.mxu1 %v2066_v12  ;;  %v688_v56 = vor.u32 %v687_v45, %v684_v44  ;;  %v2073_v44 = vld [vmem:[%s2282_s26 + $0x3c] sm:$0xff]   ;;  %v745_v45 = vrot.slane %v743_v35, 4  ;;  %v751_v46 = vrot.slane %v749_v36, 5  ;;  %v2077_v28 = vld [vmem:[%s2282_s26 + $0x54] sm:$0xff]   ;;  %v1090_v23 = vrot.slane %v2438_v0, 5 }
  0x4a   : > { %1881 = vmatmul.mubr.bf16.vlgmr.msra.gmra.mxu0 %v2065_v10  ;;  %v699_v10 = vrot.slane %v698_v59, 4  ;;  %v2465_v22 = vld [vmem:[%s2282_s26 + $0x5c] sm:$0x1] }
  0x4b   : > { %1913 = vmatmul.mubr.bf16.vlgmr.msra.gmra.mxu1 %v1662_v32  ;;  %1929 = vmatpush3.bf16.msra.mxu0 %v2066_v12  ;;  %v689_v3 = vrot.slane %v688_v56, 4  ;;  %v600_v56 = vld [vmem:[%s2282_s26 + $0x48] sm:$0xf]  ;;  %v746_v59 = vor.u32 %v745_v45, %v741_v40  ;;  %v2476_v45 = vld [vmem:[%s2716_s1 + $0x80] sm:$0xff]  }
  0x4c   : > { %1968 = vmatpush3.bf16.msra.mxu1 %v2066_v12  ;;  %1930 = vmatprep.subr.bf16.mxu0 %v2067_v25  ;;  %v711_v12 = vrot.slane %v709_v1, 5  ;;  %v704_v20 = vsel %vm2316_vm2, %v699_v10, %v703_v51  ;;  %v736_v51 = vor.u32 %v735_v39, %v732_v33  ;;  %v2441_v1 = vld [vmem:[%s2282_s26 + $0x50] sm:$0x1]  ;;  %v797_v39 = vshll.u32 %v2465_v22, 16 }
  0x4d   : > { %1961 = vmatprep.subr.bf16.mxu1 %v2067_v25  ;;  %1884 = vmatprep.mubr.bf16.mxu0 %v2068_v37  ;;  %v694_v15 = vsel %vm2316_vm2, %v689_v3, %v693_v49  ;;  %v1083_v49 = vrot.slane %v2394_v19, 5  ;;  %v757_v3 = vshll.u32 %v600_v56, 16  ;;  %v773_v4 = vshll.u32 %v2441_v1, 16 }
  0x4e   : > { %1916 = vmatprep.mubr.bf16.mxu1 %v1663_v2  ;;  %v712_v21 = vor.u32 %v711_v12, %v708_v11  ;;  %v754_v2 = vshrl.u32 %v600_v56, 16  ;;  %v747_v42 = vrot.slane %v746_v59, 4  ;;  %v1015_v56 = vld [vmem:[%s2282_s26 + $0x30] sm:$0xe] }
  0x4f   : > { %1931 = vmatpush3.bf16.msra.mxu0 %v2067_v25  ;;  %v2449_v9 = vrot.slane %v1083_v49, 4  ;;  %v759_v11 = vrot.slane %v757_v3, 5 }
  0x50   : > { %1969 = vmatpush3.bf16.msra.mxu1 %v2067_v25  ;;  %1932 = vmatprep.subr.bf16.mxu0 %v2070_v53  ;;  %v1664_v25 = vcombine.low %v694_v15, %v704_v20  ;;  %v713_v32 = vrot.slane %v712_v21, 4  ;;  %v756_v10 = vrot.slane %v754_v2, 4  ;;  %v769_v15 = vrot.slane %v767_v7, 4  ;;  %v2462_v21 = vld [vmem:[%s2282_s26 + $0x58] sm:$0xf] }
  0x51   : > { %1962 = vmatprep.subr.bf16.mxu1 %v2070_v53  ;;  %v752_v18 = vsel %vm2316_vm2, %v747_v42, %v751_v46  ;;  %v791_v33 = vshrl.u32 %v2462_v21, 16  ;;  %v1681_v42 = vrot.slane %v1015_v56, 9 }
  0x52   : > { %1885 = vmatmul.mubr.bf16.gmra.mxu0 %v2069_v55  ;;  %v718_v43 = vsel %vm2316_vm2, %v713_v32, %v717_v16  ;;  %v2076_v55 = vld [vmem:[%s2282_s26 + $0x48] sm:$0xff]   ;;  %v775_v16 = vrot.slane %v773_v4, 5  ;;  %v760_v20 = vor.u32 %v759_v11, %v756_v10  ;;  %v770_v27 = vor.u32 %v769_v15, %v765_v14  ;;  %v1013_v11 = vld [vmem:[%s2282_s26 + $0x18] sm:$0xe] }
  0x53   : > { %1933 = vmatpush3.bf16.msra.mxu0 %v2070_v53  ;;  %1888 = vmatprep.mubr.bf16.mxu0 %v2072_v6  ;;  %v1665_v58 = vcombine.low %v718_v43, %v728_v50  ;;  %v737_v6 = vrot.slane %v736_v51, 4  ;;  %v787_v32 = vshll.u32 %v2462_v21, 16  ;;  %v799_v51 = vrot.slane %v797_v39, 5 }
  0x54   : > { %1917 = vmatmul.mubr.bf16.gmra.mxu1 %v1664_v25  ;;  %1934 = vmatprep.subr.bf16.mxu0 %v2384_v5  ;;  %v761_v35 = vrot.slane %v760_v20, 4  ;;  %v1017_v20 = vld [vmem:[%s2282_s26 + $0x48] sm:$0xe] }
  0x55   : > { %1970 = vmatpush3.bf16.msra.mxu1 %v2070_v53  ;;  %v2425_v53 = vld [vmem:[%s2716_s1 + $0x90] sm:$0xff]   ;;  %1920 = vmatprep.mubr.bf16.mxu1 %v1665_v58  ;;  %v742_v12 = vsel %vm2316_vm2, %v737_v6, %v741_v40  ;;  %v771_v40 = vrot.slane %v770_v27, 4  ;;  %v789_v43 = vrot.slane %v787_v32, 5  ;;  %v1076_v58 = vrot.slane %v2376_v61, 5  ;;  %v1012_v6 = vld [vmem:[%s2282_s26 + $0xc] sm:$0xe] }
  0x56   : > { %1963 = vmatprep.subr.bf16.mxu1 %v2384_v5  ;;  %v1666_v26 = vcombine.low %v742_v12, %v752_v18  ;;  %v766_v46 = vsel %vm2316_vm2, %v761_v35, %v765_v14  ;;  %v1678_v18 = vrot.slane %v1012_v6, 9  ;;  %v1683_v47 = vrot.slane %v1017_v20, 9 }
  0x57   : > { %1935 = vmatpush3.bf16.msra.mxu0 %v2384_v5  ;;  %v776_v59 = vsel %vm2316_vm2, %v771_v40, %v775_v16  ;;  %v1078_v10 = vrot.slane %v1076_v58, 4  ;;  %v1072_v35 = vrot.slane %v2359_v34, 5 }
  0x58   : > { %1936 = vmatprep.subr.bf16.mxu0 %v2074_v41  ;;  %v1667_v7 = vcombine.low %v766_v46, %v776_v59  ;;  %v1056_v27 = vsel %vm2406_vm5, %v1678_v18, %v1055_v60  ;;  %v1100_v46 = vrot.slane %v2465_v22, 5 }
  0x59   : > { %1971 = vmatpush3.bf16.msra.mxu1 %v2384_v5  ;;  %v603_v5 = vld [vmem:[%s2282_s26 + $0x54] sm:$0xf]  ;;  %v1702_v32 = vcombine.low %v1056_v27, %v2434_v57  ;;  %v1064_v57 = vrot.slane %v1062_v52, 4 }
  0x5a   : > { %1889 = vmatmul.mubr.bf16.gmra.mxu0 %v2073_v44  ;;  %1964 = vmatprep.subr.bf16.mxu1 %v2074_v41  ;;  %v778_v24 = vshrl.u32 %v603_v5, 16  ;;  %v781_v25 = vshll.u32 %v603_v5, 16  ;;  %v793_v44 = vrot.slane %v791_v33, 4  ;;  %v1077_v5 = vsel %vm2406_vm5, %v1681_v42, %v1076_v58 }
  0x5b   : > { %1937 = vmatpush3.bf16.msra.mxu0 %v2074_v41  ;;  %1892 = vmatprep.mubr.bf16.mxu0 %v2076_v55  ;;  %v1011_v55 = vld [vmem:[%s2282_s26] sm:$0xe]  ;;  %v1065_v33 = vrot.slane %v2342_v13, 5  ;;  %v1069_v13 = vrot.slane %v2356_v29, 5 }
  0x5c   : > { %1938 = vmatprep.subr.bf16.mxu0 %v2425_v53  ;;  %v780_v36 = vrot.slane %v778_v24, 4  ;;  %v783_v38 = vrot.slane %v781_v25, 5  ;;  %1921 = vmatmul.mubr.bf16.gmra.mxu1 %v1666_v26  ;;  %v794_v2 = vor.u32 %v793_v44, %v789_v43  ;;  %v1677_v3 = vrot.slane %v1011_v55, 9 }
  0x5d   : > { %1972 = vmatpush3.bf16.msra.mxu1 %v2074_v41  ;;  %v1048_v41 = vrot.slane %v2287_v30, 5  ;;  %1924 = vmatprep.mubr.bf16.mxu1 %v1667_v7  ;;  %v1679_v24 = vrot.slane %v1013_v11, 9  ;;  %v1066_v19 = vsel %vm2406_vm5, %v1064_v57, %v1065_v33  ;;  %v1071_v39 = vrot.slane %v1069_v13, 4 }
  0x5e   : > { %1965 = vmatprep.subr.bf16.mxu1 %v2425_v53  ;;  %v784_v50 = vor.u32 %v783_v38, %v780_v36  ;;  %v795_v61 = vrot.slane %v794_v2, 4  ;;  %v1018_v36 = vld [vmem:[%s2282_s26 + $0x54] sm:$0xe]  ;;  %v1092_v38 = vrot.slane %v1090_v23, 4 }
  0x5f   : > { %1939 = vmatpush3.bf16.msra.mxu0 %v2425_v53  ;;  %v1050_v30 = vrot.slane %v1048_v41, 4  ;;  %v1049_v12 = vsel %vm2406_vm5, %v1677_v3, %v1048_v41  ;;  %v1063_v8 = vsel %vm2406_vm5, %v1679_v24, %v1062_v52 }
  0x60   : > { %1940 = vmatprep.subr.bf16.mxu0 %v2457_v17  ;;  %v785_v4 = vrot.slane %v784_v50, 4  ;;  %v800_v31 = vsel %vm2316_vm2, %v795_v61, %v799_v51  ;;  %v1703_v0 = vcombine.low %v1063_v8, %v1066_v19 }
  0x61   : > { %1973 = vmatpush3.bf16.msra.mxu1 %v2425_v53  ;;  %v1052_v14 = vsel %vm2406_vm5, %v1050_v30, %v1051_v62  ;;  %v1079_v53 = vrot.slane %v2379_v63, 5  ;;  %v1682_v63 = vrot.slane %v1016_v48, 9 }
  0x62   : > { %1893 = vmatmul.mubr.bf16.gmra.mxu0 %v2077_v28  ;;  %1966 = vmatprep.subr.bf16.mxu1 %v2457_v17  ;;  %v790_v15 = vsel %vm2316_vm2, %v785_v4, %v789_v43  ;;  %v1701_v16 = vcombine.low %v1049_v12, %v1052_v14  ;;  %v1014_v28 = vld [vmem:[%s2282_s26 + $0x24] sm:$0xe]  ;;  %v1684_v43 = vrot.slane %v1018_v36, 9 }
  0x63   : > { %1941 = vmatpush3.bf16.msra.mxu0 %v2457_v17  ;;  %v1080_v62 = vsel %vm2406_vm5, %v1078_v10, %v1079_v53  ;;  %v1668_v25 = vcombine.low %v790_v15, %v800_v31  ;;  %v1084_v60 = vsel %vm2406_vm5, %v1682_v63, %v1083_v49  ;;  %v1091_v49 = vsel %vm2406_vm5, %v1683_v47, %v1090_v23  ;;  %v2586_v63 = vld [vmem:[%s2717_s2] ss:$0 sm:$0xff] }
  0x64   : > { %1942 = vmatprep.subr.bf16.mxu0 %v2476_v45  ;;  %1944 = vmatprep.mubr.bf16.mxu0 %v1701_v16  ;;  %v1705_v26 = vcombine.low %v1077_v5, %v1080_v62 }
  0x65   : > { %1974 = vmatpush3.bf16.msra.mxu1 %v2457_v17  ;;  %v1087_v17 = vsel %vm2406_vm5, %v2449_v9, %v1086_v54  ;;  %v1093_v54 = vrot.slane %v2441_v1, 5  ;;  %v1680_v9 = vrot.slane %v1014_v28, 9  ;;  %v1097_v1 = vrot.slane %v2462_v21, 5 }
  0x66   : > { %1967 = vmatprep.subr.bf16.mxu1 %v2476_v45  ;;  %1925 = vmatmul.mubr.bf16.gmra.mxu1 %v1668_v25  ;;  %v1706_v40 = vcombine.low %v1084_v60, %v1087_v17 }
  0x67   : > { %1943 = vmatpush3.bf16.msra.mxu0 %v2476_v45  ;;  %1952 = vmatprep.mubr.bf16.mxu1 %v1705_v26  ;;  %v1094_v29 = vsel %vm2406_vm5, %v1092_v38, %v1093_v54  ;;  %v1070_v34 = vsel %vm2406_vm5, %v1680_v9, %v1069_v13  ;;  %v1099_v41 = vrot.slane %v1097_v1, 4  ;;  %v1098_v21 = vsel %vm2406_vm5, %v1684_v43, %v1097_v1 }
  0x68   : > { %v1707_v44 = vcombine.low %v1091_v49, %v1094_v29 }
  0x69   : > { %1975 = vmatpush3.bf16.msra.mxu1 %v2476_v45  ;;  %v1073_v45 = vsel %vm2406_vm5, %v1071_v39, %v1072_v35  ;;  %v1101_v51 = vsel %vm2406_vm5, %v1099_v41, %v1100_v46 }
  0x6a   : > { %1945 = vmatmul.mubr.bf16.vlgmr.msra.gmra.mxu0 %v1702_v32  ;;  %v1704_v50 = vcombine.low %v1070_v34, %v1073_v45  ;;  %v1708_v55 = vcombine.low %v1098_v21, %v1101_v51  ;;  %v2132_v45 = vmov 0.0  }
  0x6b   : > { %1948 = vmatprep.mubr.bf16.mxu0 %v1703_v0 }
  0x6e   : > { %1953 = vmatmul.mubr.bf16.vlgmr.msra.gmra.mxu1 %v1706_v40 }
  0x6f   : > { %1956 = vmatprep.mubr.bf16.mxu1 %v1707_v44 }
  0x72   : > { %1949 = vmatmul.mubr.bf16.gmra.mxu0 %v1704_v50 }
  0x76   : > { %1957 = vmatmul.mubr.bf16.gmra.mxu1 %v1708_v55 }
 0x10a   : > { %v1882_v56 = vpop.f32.mrf.mxu0 }
 0x10b   : > { %v1914_v58 = vpop.f32.mrf.mxu1  ;;  %v568_v32 = vadd.f32 %v1882_v56, %v2586_v63 }
 0x10c   : > { %v503_v59 = vpop.f32.mrf.mxu0 }
 0x10d   : > { %v932_v2 = vpop.f32.mrf.mxu1  ;;  %v566_v25 = vadd.f32 %v2586_v63, %v503_v59  ;;  %v997_v54 = vadd.f32 %v1914_v58, %v568_v32 }
 0x10e   : > { %v1883_v3 = vpop.f32.mrf.mxu0 }
 0x10f   : > { %v1915_v30 = vpop.f32.mrf.mxu1  ;;  %v995_v17 = vadd.f32 %v932_v2, %v566_v25  ;;  %v569_v57 = vadd.f32 %v1883_v3, %v2586_v63 }
 0x110   : > { %v506_v6 = vpop.f32.mrf.mxu0 }
 0x111   : > { %v935_v22 = vpop.f32.mrf.mxu1  ;;  %v567_v33 = vadd.f32 %v2586_v63, %v506_v6  ;;  %v998_v39 = vadd.f32 %v1915_v30, %v569_v57 }
 0x112   : > { %v1886_v48 = vpop.f32.mrf.mxu0 }
 0x113   : > { %v996_v9 = vadd.f32 %v935_v22, %v567_v33  ;;  %v572_v40 = vadd.f32 %v1886_v48, %v2586_v63 }
 0x114   : > { %v2555_v7 = vpop.f32.mrf.mxu1  ;;  %v519_v4 = vpop.f32.mrf.mxu0 }
 0x115   : > { %v570_v13 = vadd.f32 %v2586_v63, %v519_v4  ;;  %v1001_v6 = vadd.f32 %v2555_v7, %v572_v40 }
 0x116   : > { %v948_v42 = vpop.f32.mrf.mxu1  ;;  %v2557_v10 = vpop.f32.mrf.mxu0 }
 0x117   : > { %v999_v29 = vadd.f32 %v948_v42, %v570_v13  ;;  %v573_v4 = vadd.f32 %v2557_v10, %v2586_v63 }
 0x118   : > { %v2559_v37 = vpop.f32.mrf.mxu1  ;;  %v522_v11 = vpop.f32.mrf.mxu0 }
 0x119   : > { %v571_v43 = vadd.f32 %v2586_v63, %v522_v11 }
 0x11a   : > { %v2561_v61 = vpop.f32.mrf.mxu1  ;;  %v2563_v12 = vpop.f32.mrf.mxu0 }
 0x11b   : > { %v1000_v42 = vadd.f32 %v2561_v61, %v571_v43 }
 0x11c   : > { %v2565_v14 = vpop.f32.mrf.mxu0  ;;  %v2567_v53 = vpop.f32.mrf.mxu1 }
 0x11d   : > { %v574_v25 = vadd.f32 %v2586_v63, %v2565_v14  ;;  %v576_v14 = vadd.f32 %v2563_v12, %v2586_v63 }
 0x11e   : > { %v2569_v15 = vpop.f32.mrf.mxu0  ;;  %v2571_v16 = vpop.f32.mrf.mxu1 }
 0x11f   : > { %v1005_v43 = vadd.f32 %v2567_v53, %v576_v14 }
 0x120   : > { %v2573_v5 = vpop.f32.mrf.mxu0  ;;  %v2575_v18 = vpop.f32.mrf.mxu1 }
 0x122   : > { %v2577_v20 = vpop.f32.mrf.mxu0  ;;  %v2579_v31 = vpop.f32.mrf.mxu1 }
 0x124   : > { %v2581_v62 = vpop.f32.mrf.mxu0 }
 0x125   : > { %v578_v53 = vadd.f32 %v2586_v63, %v2581_v62 }
 0x126   : > { %v2588_v24 = vpop.f32.mrf.mxu0  ;;  %v2591_v26 = vpop.f32.mrf.mxu1 }
 0x128   : > { %v2593_v27 = vpop.f32.mrf.mxu0  ;;  %v2595_v52 = vpop.f32.mrf.mxu1 }
 0x12a   : > { %v1946_v28 = vpop.f32.mrf.mxu0  ;;  %v2599_v47 = vpop.f32.mrf.mxu1 }
 0x12b   : > { %v1298_v49 = vadd.f32 %v1946_v28, %v997_v54  ;;  %v1002_v54 = vadd.f32 %v2559_v37, %v573_v4 }
 0x12c   : > { %v1233_v60 = vpop.f32.mrf.mxu0  ;;  %v2603_v35 = vpop.f32.mrf.mxu1 }
 0x12d   : > { %v1296_v8 = vadd.f32 %v1233_v60, %v995_v17 }
 0x12e   : > { %v1947_v23 = vpop.f32.mrf.mxu0  ;;  %v2609_v44 = vpop.f32.mrf.mxu1 }
 0x12f   : > { %vm1318_vm6 = vcmp.ge.f32.partialorder %v1296_v8, 1.0  ;;  %v1299_v51 = vadd.f32 %v1947_v23, %v998_v39 }
 0x130   : > { %v1334_v36 = vsel %vm1318_vm6, 0.0, %v1296_v8  ;;  %v1236_v19 = vpop.f32.mrf.mxu0  ;;  %v1717_v41 = vsel %vm1318_vm6, 1.0, %v2132_v45  ;;  %v1265_v22 = vpop.f32.mrf.mxu1 }
 0x131   : > { %v1336_v38 = vmul.f32 0.5, %v1334_v36  ;;  %v1297_v0 = vadd.f32 %v1236_v19, %v996_v9  ;;  %v1003_v9 = vadd.f32 %v2571_v16, %v574_v25  ;;  %v575_v36 = vadd.f32 %v2586_v63, %v2573_v5 }
 0x132   : > { %v1950_v1 = vpop.f32.mrf.mxu0  ;;  %v1955_v8 = vpop.f32.mrf.mxu1 }
 0x133   : > { %v1338_v34 = vadd.f32 %v1336_v38, %v1298_v49  ;;  %vm1319_vm7 = vcmp.ge.f32.partialorder %v1297_v0, 1.0  ;;  %v1302_v57 = vadd.f32 %v1950_v1, %v1001_v6  ;;  %v1304_v40 = vadd.f32 %v1265_v22, %v1003_v9 }
 0x134   : > { %v1718_v46 = vsel %vm1319_vm7, 1.0, %v2132_v45  ;;  %v1335_v50 = vsel %vm1319_vm7, 0.0, %v1297_v0  ;;  %v1249_v21 = vpop.f32.mrf.mxu0  ;;  %v1268_v19 = vpop.f32.mrf.mxu1  ;;  %v1004_v5 = vadd.f32 %v2579_v31, %v575_v36  ;;  %v579_v6 = vadd.f32 %v2586_v63, %v2593_v27 }
 0x135   : > { %v1786_v55 = vpack.c.bf16 %v1718_v46, %v1717_v41  ;;  %v1337_v56 = vmul.f32 0.5, %v1335_v50  ;;  %vm1340_vm8 = vcmp.ge.f32.partialorder %v1338_v34, 1.0  ;;  %v1300_v3 = vadd.f32 %v1249_v21, %v999_v29 }
 0x136   : > { %v1357_v58 = vsel %vm1340_vm8, 0.0, %v1338_v34  ;;  %v1951_v59 = vpop.f32.mrf.mxu0  ;;  %v1721_v28 = vsel %vm1340_vm8, 1.0, %v2132_v45  ;;  %v1958_v34 = vpop.f32.mrf.mxu1  ;;  %v577_v46 = vadd.f32 %v2569_v15, %v2586_v63 }
 0x137   : > { %1787 = vst [vmem:[%s2615_s18] sm:$0xff] %v1786_v55   ;;  %v1339_v2 = vadd.f32 %v1337_v56, %v1299_v51  ;;  %v1359_v30 = vmul.f32 0.5, %v1357_v58  ;;  %v1303_v37 = vadd.f32 %v1951_v59, %v1002_v54  ;;  %v1305_v55 = vadd.f32 %v1268_v19, %v1004_v5 }
 0x138   : > { %v1252_v48 = vpop.f32.mrf.mxu0  ;;  %v1281_v59 = vpop.f32.mrf.mxu1  ;;  %v1006_v15 = vadd.f32 %v2575_v18, %v577_v46  ;;  %v580_v18 = vadd.f32 %v2577_v20, %v2586_v63 }
 0x139   : > { %v1361_v11 = vadd.f32 %v1359_v30, %v1300_v3  ;;  %vm1341_vm9 = vcmp.ge.f32.partialorder %v1339_v2, 1.0  ;;  %v1301_v7 = vadd.f32 %v1252_v48, %v1000_v42  ;;  %v1007_v48 = vadd.f32 %v2595_v52, %v578_v53 }
 0x13a   : > { %v1722_v32 = vsel %vm1341_vm9, 1.0, %v2132_v45  ;;  %v1358_v17 = vsel %vm1341_vm9, 0.0, %v1339_v2  ;;  %v1306_v2 = vadd.f32 %v2609_v44, %v1005_v43  ;;  %v1959_v62 = vpop.f32.mrf.mxu1  ;;  %v1307_v44 = vadd.f32 %v1955_v8, %v1006_v15 }
 0x13b   : > { %vm1363_vm10 = vcmp.ge.f32.partialorder %v1361_v11, 1.0  ;;  %v1789_v33 = vpack.c.bf16 %v1722_v32, %v1721_v28  ;;  %v1360_v60 = vmul.f32 0.5, %v1358_v17  ;;  %v1308_v27 = vadd.f32 %v1281_v59, %v1007_v48 }
 0x13c   : > { %v1380_v10 = vsel %vm1363_vm10, 0.0, %v1361_v11  ;;  %v1727_v49 = vsel %vm1363_vm10, 1.0, %v2132_v45  ;;  %v581_v52 = vadd.f32 %v2588_v24, %v2586_v63  ;;  %v1009_v8 = vadd.f32 %v2591_v26, %v580_v18 }
 0x13d   : > { %v1382_v61 = vmul.f32 0.5, %v1380_v10  ;;  %1809 = vst [vmem:[%s2615_s18 + $0x8] sm:$0xff] %v1789_v33   ;;  %v1362_v23 = vadd.f32 %v1360_v60, %v1301_v7  ;;  %v1284_v33 = vpop.f32.mrf.mxu1  ;;  %v1008_v60 = vadd.f32 %v2603_v35, %v579_v6 }
 0x13e   : > { %v1010_v24 = vadd.f32 %v2599_v47, %v581_v52 }
 0x13f   : > { %v1384_v13 = vadd.f32 %v1382_v61, %v1302_v57  ;;  %vm1364_vm11 = vcmp.ge.f32.partialorder %v1362_v23, 1.0 }
 0x140   : > { %v1728_v38 = vsel %vm1364_vm11, 1.0, %v2132_v45  ;;  %v1381_v0 = vsel %vm1364_vm11, 0.0, %v1362_v23  ;;  %v1309_v23 = vadd.f32 %v1284_v33, %v1008_v60 }
 0x141   : > { %vm1386_vm12 = vcmp.ge.f32.partialorder %v1384_v13, 1.0  ;;  %v1792_v39 = vpack.c.bf16 %v1728_v38, %v1727_v49  ;;  %v1383_v1 = vmul.f32 0.5, %v1381_v0  ;;  %v1311_v38 = vadd.f32 %v1959_v62, %v1010_v24 }
 0x142   : > { %v1403_v12 = vsel %vm1386_vm12, 0.0, %v1384_v13  ;;  %v1733_v50 = vsel %vm1386_vm12, 1.0, %v2132_v45  ;;  %v1310_v13 = vadd.f32 %v1958_v34, %v1009_v8 }
 0x143   : > { %v1405_v29 = vmul.f32 0.5, %v1403_v12  ;;  %1810 = vst [vmem:[%s2615_s18 + $0x10] sm:$0xff] %v1792_v39   ;;  %v1385_v16 = vadd.f32 %v1383_v1, %v1303_v37 }
 0x145   : > { %v1407_v41 = vadd.f32 %v1405_v29, %v1304_v40  ;;  %vm1387_vm13 = vcmp.ge.f32.partialorder %v1385_v16, 1.0 }
 0x146   : > { %v1734_v21 = vsel %vm1387_vm13, 1.0, %v2132_v45  ;;  %v1404_v51 = vsel %vm1387_vm13, 0.0, %v1385_v16 }
 0x147   : > { %vm1409_vm14 = vcmp.ge.f32.partialorder %v1407_v41, 1.0  ;;  %v1795_v56 = vpack.c.bf16 %v1734_v21, %v1733_v50  ;;  %v1406_v58 = vmul.f32 0.5, %v1404_v51 }
 0x148   : > { %v1426_v31 = vsel %vm1409_vm14, 0.0, %v1407_v41  ;;  %v1739_v4 = vsel %vm1409_vm14, 1.0, %v2132_v45 }
 0x149   : > { %v1428_v3 = vmul.f32 0.5, %v1426_v31  ;;  %1811 = vst [vmem:[%s2615_s18 + $0x18] sm:$0xff] %v1795_v56   ;;  %v1408_v30 = vadd.f32 %v1406_v58, %v1305_v55 }
 0x14b   : > { %v1430_v22 = vadd.f32 %v1428_v3, %v1306_v2  ;;  %vm1410_vm15 = vcmp.ge.f32.partialorder %v1408_v30, 1.0 }
 0x14c   : > { %v1740_v42 = vsel %vm1410_vm15, 1.0, %v2132_v45  ;;  %v1427_v11 = vsel %vm1410_vm15, 0.0, %v1408_v30 }
 0x14d   : > { %vm1432_vm0 = vcmp.ge.f32.partialorder %v1430_v22, 1.0  ;;  %v1798_v25 = vpack.c.bf16 %v1740_v42, %v1739_v4  ;;  %v1429_v28 = vmul.f32 0.5, %v1427_v11 }
 0x14e   : > { %v1449_v32 = vsel %vm1432_vm0, 0.0, %v1430_v22  ;;  %v1745_v57 = vsel %vm1432_vm0, 1.0, %v2132_v45 }
 0x14f   : > { %v1451_v17 = vmul.f32 0.5, %v1449_v32  ;;  %1812 = vst [vmem:[%s2615_s18 + $0x20] sm:$0xff] %v1798_v25   ;;  %v1431_v7 = vadd.f32 %v1429_v28, %v1307_v44 }
 0x151   : > { %v1453_v10 = vadd.f32 %v1451_v17, %v1308_v27  ;;  %vm1433_vm1 = vcmp.ge.f32.partialorder %v1431_v7, 1.0 }
 0x152   : > { %v1746_v20 = vsel %vm1433_vm1, 1.0, %v2132_v45  ;;  %v1450_v61 = vsel %vm1433_vm1, 0.0, %v1431_v7 }
 0x153   : > { %vm1455_vm2 = vcmp.ge.f32.partialorder %v1453_v10, 1.0  ;;  %v1801_v54 = vpack.c.bf16 %v1746_v20, %v1745_v57  ;;  %v1452_v14 = vmul.f32 0.5, %v1450_v61 }
 0x154   : > { %v1472_v9 = vsel %vm1455_vm2, 0.0, %v1453_v10  ;;  %v1751_v26 = vsel %vm1455_vm2, 1.0, %v2132_v45 }
 0x155   : > { %v1474_v36 = vmul.f32 0.5, %v1472_v9  ;;  %1813 = vst [vmem:[%s2615_s18 + $0x28] sm:$0xff] %v1801_v54   ;;  %v1454_v63 = vadd.f32 %v1452_v14, %v1309_v23 }
 0x157   : > { %v1476_v35 = vadd.f32 %v1474_v36, %v1310_v13  ;;  %vm1456_vm3 = vcmp.ge.f32.partialorder %v1454_v63, 1.0 }
 0x158   : > { %v1752_v19 = vsel %vm1456_vm3, 1.0, %v2132_v45  ;;  %v1473_v49 = vsel %vm1456_vm3, 0.0, %v1454_v63 }
 0x159   : > { %v1804_v0 = vpack.c.bf16 %v1752_v19, %v1751_v26  ;;  %v1475_v37 = vmul.f32 0.5, %v1473_v49  ;;  %vm1478_vm4 = vcmp.ge.f32.partialorder %v1476_v35, 1.0 }
 0x15a   : > { %v1757_v1 = vsel %vm1478_vm4, 1.0, %v2132_v45 }
 0x15b   : > { %1814 = vst [vmem:[%s2615_s18 + $0x30] sm:$0xff] %v1804_v0   ;;  %v1477_v39 = vadd.f32 %v1475_v37, %v1311_v38 }
 0x15d   : > { %vm1479_vm5 = vcmp.ge.f32.partialorder %v1477_v39, 1.0 }
 0x15e   : > { %v1758_v47 = vsel %vm1479_vm5, 1.0, %v2132_v45 }
 0x15f   : > { %v1807_v12 = vpack.c.bf16 %v1758_v47, %v1757_v1 }
 0x161   : > { %1815 = vst [vmem:[%s2615_s18 + $0x38] sm:$0xff] %v1807_v12  }
 0x162   : > { %s1784_s21 = sshll.u32 %s2122_s15, 7  ;;  %s1526_s23 = sshll.u32 %s2615_s18, 4  ;;  %s1527_s23 = int_to_ptr.vmem [resolvable:$true] %s1526_s23 }
 0x163   : > { %s1515_s29 = scalar_lea.hbm %s2718_s3, %s1784_s21  ;;  %s2133_s30 = smov 128  }
 0x164   : > { %1979 = sst [smem:[#allocation7]] (%p2199_p5), %s2133_s30  ;;  %s2134_s10 = smov 256  }
 0x165   : > { %1980 = sst [smem:[#allocation7 + $0x1]] (%p2199_p5), %s2134_s10  ;;  %s2135_s4 = smov 2  }
 0x166   : > { %1981 = sst [smem:[#allocation7 + $0x2]] (%p2199_p5), %s2135_s4  ;;  %s2136_s5 = smov 64  }
 0x167   : > { %1982 = sst [smem:[#allocation7 + $0x3]] (%p2199_p5), %s2136_s5  ;;  %s2137_s15 = smov 4  }
 0x168   : > { %1983 = sst [smem:[#allocation7 + $0x4]] (%p2199_p5), %s2136_s5  ;;  %s2138_s6 = smov 131072  }
 0x169   : > { %1984 = sst [smem:[#allocation7 + $0x5]] (%p2199_p5), %s2137_s15  ;;  %s2139_s7 = smov 0  }
 0x16a   : > { %1985 = dma.general (%p2199_p5), %s1527_s23, 1024, %s1515_s29, %s1500_s19, %s2138_s6, [#allocation7], %s2139_s7, 0  }
 0x16b PF: > { %s1554_s8 = sand.u32 1, %s2110_s12   ;;  %p1988_p0 = pnand %p1624_p10, %p2210_p9 }
 0x16c   : > { %s1555_s26 = scalar_lea.sflag [#allocation5], %s1554_s8 }
 0x16d   : > { %p1989_p1 = pneg %p1988_p0 }
 0x16f   : > { %2105 = dma.done.wait (%p1989_p1), %s1555_s26, 1024  }
 0x170   : > { %2107 = vsyncadd (%p1989_p1), %s1555_s26, 4294966272  ;;  %s16_s17 = sadd.s32 1, %s2130_s17   ;;  %s2725_s12 = smov %s2114_s13 }
 0x171   : > { %p13_p2 = scmp.ge.s32.totalorder %s16_s17, 4   ;;  %s2726_s13 = smov %s2118_s14 }
 0x172   : > { %s2727_s14 = smov %s2208_s24  ;;  %s2728_s15 = smov %s2126_s16 }
 0x173   : > { %s2729_s16 = smov %s2731_s20  ;;  %15 = sbr.rel (!%p13_p2) target bundleno = 4 (0x4), region = 131 }
 0x178   :  { %1560 = vsyncpa [#allocation5], 1 }
 0x179   :  { %1562 = vsyncpa [#allocation5 + $0x1], 1 }

</bundles_post_ra>
